<compile_context>
chip_gen: v6e
topology: v6e:2x2x1
jax: 0.10.0
libtpu: 0.0.40
codegen_flags: <defaults>
</compile_context>

<pallas_src>
import functools

import numpy as np

import jax
import jax.numpy as jnp
from jax import lax
from jax.experimental import pallas as pl
from jax.experimental.pallas import tpu as pltpu

# ---- config (small, deterministic) ----
VOCAB_SIZE = 50
EMBED_DIM = 32
NUM_FILTERS = 8
FILTER_SIZES = (2, 3, 4)
NUM_LABELS = 4
SEQ_LEN = 8
BATCH = 2


def textcnn_kernel(idw_ref, emb_ref, wconv_ref, bconv_ref, mask_ref,
                   fcw_ref, fcb_ref, out_ref, *, B, S, E, Vpad, k_max, FNF):
    """idw_ref: [k_max, B*S, 1] int32 windowed ids; emb_ref: [Vpad, E];
    wconv_ref: [k_max*E, FNF]; bconv_ref: [1, FNF]; mask_ref: [B*S, FNF];
    fcw_ref: [FNF, L]; fcb_ref: [1, L]; out_ref: [B, L]."""
    BS = B * S
    emb = emb_ref[...]                                        # [Vpad, E] (loaded once)
    voc = lax.broadcasted_iota(jnp.int32, (BS, Vpad), 1)

    # ---- one-hot MXU gather per tap; window assembled in vregs (lane concat) ----
    taps = []
    for j in range(k_max):
        oh = (voc == idw_ref[j]).astype(jnp.float32)          # [BS, Vpad] VPU compare
        taps.append(jnp.dot(oh, emb,
                            preferred_element_type=jnp.float32))   # [BS, E]
    win = jnp.concatenate(taps, axis=1)                       # [BS, k_max*E] = [16, 128]

    # ---- single fused conv matmul (K = k_max*E = 128) + bias + ReLU + static mask ----
    conv = jnp.dot(win, wconv_ref[...],
                   preferred_element_type=jnp.float32)        # [BS, FNF]
    # Masking to 0 is valid only because it is post-ReLU (outputs >= 0).
    conv = jnp.maximum(conv + bconv_ref[...], 0.0) * mask_ref[...]

    # ---- tile-aligned max-pool over time (T padded to S = 8 sublanes) ----
    feats = jnp.max(conv.reshape(B, S, FNF), axis=1)          # [B, FNF]

    # Dropout is identity in eval mode (deterministic forward).
    logits = jnp.dot(feats, fcw_ref[...],
                     preferred_element_type=jnp.float32) + fcb_ref[...]
    out_ref[...] = logits.astype(out_ref.dtype)


def textcnn_forward(ids, params):
    """ids: [B, S] int32 token ids (the `x[0]` of the PyTorch forward)."""
    emb_table = params["embedding"]                    # [V, E]
    V, E = emb_table.shape
    B, S = ids.shape
    NF = params["conv_w"][0].shape[-1]
    L = params["fc_b"].shape[-1]
    k_max = max(FILTER_SIZES)
    FNF = NF * len(FILTER_SIZES)
    BS = B * S
    Vpad = ((V + 63) // 64) * 64                       # sublane-friendly vocab pad

    ids = ids.astype(jnp.int32)

    # 2-D embedding table, zero-padded rows (NOT [V,1,E]) -> one contiguous slab DMA.
    # NOTE: kept f32 to match PyTorch f32 numerics exactly; on v6e/v7x cast emb_pad /
    # w_conv to bf16 here (f32 accumulation is preserved via preferred_element_type)
    # if ~1e-2 tolerance is acceptable.
    emb_pad = jnp.zeros((Vpad, E), jnp.float32).at[:V].set(emb_table)

    # Pack all conv weights into ONE im2col weight [k_max*E, FNF] (+ [1, FNF] bias),
    # zero-padding the missing taps of the smaller filters.
    blocks = []
    for w in params["conv_w"]:                         # each [k, E, NF]
        k = w.shape[0]
        w_pad = jnp.pad(w, ((0, k_max - k), (0, 0), (0, 0)))
        blocks.append(w_pad.reshape(k_max * E, NF))
    w_conv = jnp.concatenate(blocks, axis=1)           # [k_max*E, FNF]
    b_conv = jnp.concatenate(params["conv_b"], axis=1)  # [1, FNF]

    # Windowed token ids: ids_win[j, b*S + t, 0] = ids[b, t + j]; positions that run
    # past the sequence are clamped to the padding index (their conv outputs are
    # masked below and/or hit zero-padded weight taps, so the value is irrelevant).
    pos = jnp.arange(S)[None, :]
    cols = []
    for j in range(k_max):
        shifted = jnp.where(pos + j < S, jnp.roll(ids, -j, axis=1), V - 1)  # [B, S]
        cols.append(shifted.reshape(BS))
    ids_win = jnp.stack(cols, axis=0).reshape(k_max, BS, 1).astype(jnp.int32)

    # Static per-filter time-validity mask, built with numpy in the wrapper
    # (hoisted out of the kernel): invalid trailing positions -> 0.
    mask_np = np.zeros((S, FNF), np.float32)
    for f, k in enumerate(FILTER_SIZES):
        mask_np[:S - k + 1, f * NF:(f + 1) * NF] = 1.0
    mask = jnp.asarray(np.tile(mask_np, (B, 1)))       # [BS, FNF]

    kernel = functools.partial(textcnn_kernel, B=B, S=S, E=E, Vpad=Vpad,
                               k_max=k_max, FNF=FNF)

    vmem = pl.BlockSpec(memory_space=pltpu.MemorySpace.VMEM)

    flops = (2 * k_max * BS * Vpad * E            # one-hot gather matmuls
             + 2 * BS * (k_max * E) * FNF         # fused conv matmul
             + 2 * B * FNF * L)                   # fc
    bytes_accessed = 4 * (ids_win.size + emb_pad.size + w_conv.size + b_conv.size
                          + mask.size + params["fc_w"].size + params["fc_b"].size
                          + B * L)

    # TODO(synk): if B ever scales, grid over 8-row-aligned batch blocks with
    # dimension_semantics=("parallel",) so both v7x TensorCores are used.
    call = pl.pallas_call(
        kernel,
        out_shape=jax.ShapeDtypeStruct((B, L), jnp.float32),
        in_specs=[vmem, vmem, vmem, vmem, vmem, vmem, vmem],
        out_specs=vmem,
        compiler_params=pltpu.CompilerParams(vmem_limit_bytes=4 * 1024 * 1024),
        cost_estimate=pl.CostEstimate(flops=flops, transcendentals=0,
                                      bytes_accessed=bytes_accessed),
    )
    return call(ids_win, emb_pad, w_conv, b_conv, mask,
                params["fc_w"], params["fc_b"])


def init_params(key):
    keys = jax.random.split(key, 2 + 2 * len(FILTER_SIZES) + 2)
    ki = iter(keys)

    # Embedding: N(0,1) like nn.Embedding, with padding_idx (=V-1) row zeroed.
    emb = jax.random.normal(next(ki), (VOCAB_SIZE, EMBED_DIM), jnp.float32)
    emb = emb.at[VOCAB_SIZE - 1].set(0.0)

    conv_w, conv_b = [], []
    for k in FILTER_SIZES:
        # PyTorch Conv2d weight [NF, 1, k, E]; stored here as [k, E, NF].
        fan_in = 1 * k * EMBED_DIM
        bound = 1.0 / jnp.sqrt(fan_in)
        w = jax.random.uniform(next(ki), (k, EMBED_DIM, NUM_FILTERS),
                               jnp.float32, -bound, bound)
        b = jax.random.uniform(next(ki), (1, NUM_FILTERS),
                               jnp.float32, -bound, bound)
        conv_w.append(w)
        conv_b.append(b)

    fc_in = NUM_FILTERS * len(FILTER_SIZES)
    bound = 1.0 / jnp.sqrt(fc_in)
    fc_w = jax.random.uniform(next(ki), (fc_in, NUM_LABELS),
                              jnp.float32, -bound, bound)
    fc_b = jax.random.uniform(next(ki), (1, NUM_LABELS),
                              jnp.float32, -bound, bound)

    return {"embedding": emb, "conv_w": conv_w, "conv_b": conv_b,
            "fc_w": fc_w, "fc_b": fc_b}


def reference_forward(ids, params):
    """Pure-JAX reference of the same math (for sanity check)."""
    emb = jnp.take(params["embedding"], ids, axis=0)  # [B,S,E]
    feats = []
    for (w, b, k) in zip(params["conv_w"], params["conv_b"], FILTER_SIZES):
        T = SEQ_LEN - k + 1
        acc = jnp.zeros((BATCH, T, NUM_FILTERS), jnp.float32)
        for j in range(k):
            acc = acc + jnp.einsum("bte,ef->btf", emb[:, j:j + T, :], w[j],
                                   preferred_element_type=jnp.float32)
        acc = jnp.maximum(acc + b.reshape(1, 1, NUM_FILTERS), 0.0)
        feats.append(jnp.max(acc, axis=1))
    feats = jnp.concatenate(feats, axis=1)
    return feats @ params["fc_w"] + params["fc_b"]


if __name__ == "__main__":
    key = jax.random.PRNGKey(0)
    pkey, ikey = jax.random.split(key)
    params = init_params(pkey)
    ids = jax.random.randint(ikey, (BATCH, SEQ_LEN), 0, VOCAB_SIZE, jnp.int32)

    logits = textcnn_forward(ids, params)
    jax.block_until_ready(logits)

    ref = reference_forward(ids, params)
    assert logits.shape == (BATCH, NUM_LABELS)
    assert jnp.allclose(logits, ref, atol=1e-4, rtol=1e-4)

    print("KERNEL_OK")
</pallas_src>

<mosaic_0001>
module attributes {stable_mosaic.version = 11 : i64} {
  func.func @textcnn_kernel(%arg0: memref<4x16x1xi32, #tpu.memory_space<vmem>>, %arg1: memref<64x32xf32, #tpu.memory_space<vmem>>, %arg2: memref<128x24xf32, #tpu.memory_space<vmem>>, %arg3: memref<1x24xf32, #tpu.memory_space<vmem>>, %arg4: memref<16x24xf32, #tpu.memory_space<vmem>>, %arg5: memref<24x4xf32, #tpu.memory_space<vmem>>, %arg6: memref<1x4xf32, #tpu.memory_space<vmem>>, %arg7: memref<2x4xf32, #tpu.memory_space<vmem>>) attributes {dimension_semantics = [], scalar_prefetch = 0 : i64, scratch_operands = 0 : i64, tpu.core_type = #tpu.core_type<tc>} {
    %c0 = arith.constant 0 : index
    %c0_0 = arith.constant 0 : index
    %0 = vector.load %arg1[%c0, %c0_0] : memref<64x32xf32, #tpu.memory_space<vmem>>, vector<64x32xf32>
    %1 = tpu.iota {dimensions = array<i32: 1>} : vector<16x64xi32>
    %c0_1 = arith.constant 0 : index
    %c0_2 = arith.constant 0 : index
    %c0_3 = arith.constant 0 : index
    %2 = vector.load %arg0[%c0_1, %c0_2, %c0_3] : memref<4x16x1xi32, #tpu.memory_space<vmem>>, vector<1x16x1xi32>
    %3 = vector.shape_cast %2 : vector<1x16x1xi32> to vector<16x1xi32>
    %4 = vector.broadcast %3 : vector<16x1xi32> to vector<16x64xi32>
    %5 = arith.cmpi eq, %1, %4 : vector<16x64xi32>
    %6 = arith.extui %5 : vector<16x64xi1> to vector<16x64xi32>
    %7 = arith.sitofp %6 : vector<16x64xi32> to vector<16x64xf32>
    %cst = arith.constant dense<0.000000e+00> : vector<16x32xf32>
    %8 = tpu.matmul %7, %0, %cst {dimension_numbers = #tpu.dot_dimension_numbers<[1], [0], [0], [1], [0, 0, 1, 1], [], []>} : vector<16x64xf32>, vector<64x32xf32>, vector<16x32xf32> -> vector<16x32xf32>
    %c1 = arith.constant 1 : index
    %c0_4 = arith.constant 0 : index
    %c0_5 = arith.constant 0 : index
    %9 = vector.load %arg0[%c1, %c0_4, %c0_5] : memref<4x16x1xi32, #tpu.memory_space<vmem>>, vector<1x16x1xi32>
    %10 = vector.shape_cast %9 : vector<1x16x1xi32> to vector<16x1xi32>
    %11 = vector.broadcast %10 : vector<16x1xi32> to vector<16x64xi32>
    %12 = arith.cmpi eq, %1, %11 : vector<16x64xi32>
    %13 = arith.extui %12 : vector<16x64xi1> to vector<16x64xi32>
    %14 = arith.sitofp %13 : vector<16x64xi32> to vector<16x64xf32>
    %cst_6 = arith.constant dense<0.000000e+00> : vector<16x32xf32>
    %15 = tpu.matmul %14, %0, %cst_6 {dimension_numbers = #tpu.dot_dimension_numbers<[1], [0], [0], [1], [0, 0, 1, 1], [], []>} : vector<16x64xf32>, vector<64x32xf32>, vector<16x32xf32> -> vector<16x32xf32>
    %c2 = arith.constant 2 : index
    %c0_7 = arith.constant 0 : index
    %c0_8 = arith.constant 0 : index
    %16 = vector.load %arg0[%c2, %c0_7, %c0_8] : memref<4x16x1xi32, #tpu.memory_space<vmem>>, vector<1x16x1xi32>
    %17 = vector.shape_cast %16 : vector<1x16x1xi32> to vector<16x1xi32>
    %18 = vector.broadcast %17 : vector<16x1xi32> to vector<16x64xi32>
    %19 = arith.cmpi eq, %1, %18 : vector<16x64xi32>
    %20 = arith.extui %19 : vector<16x64xi1> to vector<16x64xi32>
    %21 = arith.sitofp %20 : vector<16x64xi32> to vector<16x64xf32>
    %cst_9 = arith.constant dense<0.000000e+00> : vector<16x32xf32>
    %22 = tpu.matmul %21, %0, %cst_9 {dimension_numbers = #tpu.dot_dimension_numbers<[1], [0], [0], [1], [0, 0, 1, 1], [], []>} : vector<16x64xf32>, vector<64x32xf32>, vector<16x32xf32> -> vector<16x32xf32>
    %c3 = arith.constant 3 : index
    %c0_10 = arith.constant 0 : index
    %c0_11 = arith.constant 0 : index
    %23 = vector.load %arg0[%c3, %c0_10, %c0_11] : memref<4x16x1xi32, #tpu.memory_space<vmem>>, vector<1x16x1xi32>
    %24 = vector.shape_cast %23 : vector<1x16x1xi32> to vector<16x1xi32>
    %25 = vector.broadcast %24 : vector<16x1xi32> to vector<16x64xi32>
    %26 = arith.cmpi eq, %1, %25 : vector<16x64xi32>
    %27 = arith.extui %26 : vector<16x64xi1> to vector<16x64xi32>
    %28 = arith.sitofp %27 : vector<16x64xi32> to vector<16x64xf32>
    %cst_12 = arith.constant dense<0.000000e+00> : vector<16x32xf32>
    %29 = tpu.matmul %28, %0, %cst_12 {dimension_numbers = #tpu.dot_dimension_numbers<[1], [0], [0], [1], [0, 0, 1, 1], [], []>} : vector<16x64xf32>, vector<64x32xf32>, vector<16x32xf32> -> vector<16x32xf32>
    %30 = tpu.concatenate %8, %15, %22, %29 in 1 : vector<16x32xf32>, vector<16x32xf32>, vector<16x32xf32>, vector<16x32xf32> -> vector<16x128xf32>
    %c0_13 = arith.constant 0 : index
    %c0_14 = arith.constant 0 : index
    %31 = vector.load %arg2[%c0_13, %c0_14] : memref<128x24xf32, #tpu.memory_space<vmem>>, vector<128x24xf32>
    %cst_15 = arith.constant dense<0.000000e+00> : vector<16x24xf32>
    %32 = tpu.matmul %30, %31, %cst_15 {dimension_numbers = #tpu.dot_dimension_numbers<[1], [0], [0], [1], [0, 0, 1, 1], [], []>} : vector<16x128xf32>, vector<128x24xf32>, vector<16x24xf32> -> vector<16x24xf32>
    %c0_16 = arith.constant 0 : index
    %c0_17 = arith.constant 0 : index
    %33 = vector.load %arg3[%c0_16, %c0_17] : memref<1x24xf32, #tpu.memory_space<vmem>>, vector<1x24xf32>
    %34 = vector.broadcast %33 : vector<1x24xf32> to vector<16x24xf32>
    %35 = arith.addf %32, %34 : vector<16x24xf32>
    %cst_18 = arith.constant 0.000000e+00 : f32
    %36 = vector.broadcast %cst_18 : f32 to vector<16x24xf32>
    %37 = arith.maximumf %35, %36 : vector<16x24xf32>
    %c0_19 = arith.constant 0 : index
    %c0_20 = arith.constant 0 : index
    %38 = vector.load %arg4[%c0_19, %c0_20] : memref<16x24xf32, #tpu.memory_space<vmem>>, vector<16x24xf32>
    %39 = arith.mulf %37, %38 : vector<16x24xf32>
    %40 = vector.shape_cast %39 : vector<16x24xf32> to vector<2x8x24xf32>
    %cst_21 = arith.constant dense<0xFF800000> : vector<2x24xf32>
    %41 = vector.multi_reduction <maximumf>, %40, %cst_21 [1] : vector<2x8x24xf32> to vector<2x24xf32>
    %c0_22 = arith.constant 0 : index
    %c0_23 = arith.constant 0 : index
    %42 = vector.load %arg5[%c0_22, %c0_23] : memref<24x4xf32, #tpu.memory_space<vmem>>, vector<24x4xf32>
    %cst_24 = arith.constant dense<0.000000e+00> : vector<2x4xf32>
    %43 = tpu.matmul %41, %42, %cst_24 {dimension_numbers = #tpu.dot_dimension_numbers<[1], [0], [0], [1], [0, 0, 1, 1], [], []>} : vector<2x24xf32>, vector<24x4xf32>, vector<2x4xf32> -> vector<2x4xf32>
    %c0_25 = arith.constant 0 : index
    %c0_26 = arith.constant 0 : index
    %44 = vector.load %arg6[%c0_25, %c0_26] : memref<1x4xf32, #tpu.memory_space<vmem>>, vector<1x4xf32>
    %45 = vector.broadcast %44 : vector<1x4xf32> to vector<2x4xf32>
    %46 = arith.addf %43, %45 : vector<2x4xf32>
    %c0_27 = arith.constant 0 : index
    %c0_28 = arith.constant 0 : index
    %47 = vector.load %arg7[%c0_27, %c0_28] : memref<2x4xf32, #tpu.memory_space<vmem>>, vector<2x4xf32>
    tpu.vector_store %arg7[%c0_27, %c0_28], %46 {strides = array<i32>} : memref<2x4xf32, #tpu.memory_space<vmem>>, vector<2x4xf32>,
    return
  }
}

</mosaic_0001>

<bundles_post_ra>
// kernel: tpu_custom_call.1
= control target key start
LH: loop header
LB: loop body
LE: loop exit
PB: predicated region body
PF: predicated region fallthrough
CT: control target
= control target key end

     0   :  { %v927_v2 = vmov 0   ;;  %s1209_s0 = inlined_call_operand.vmem [shape: s32[4,16,1], index: 0, kind: input, shape index: {}]   ;;  %s1210_s1 = inlined_call_operand.vmem [shape: f32[64,32], index: 1, kind: input, shape index: {}]   ;;  %s1211_s2 = inlined_call_operand.vmem [shape: f32[128,24], index: 2, kind: input, shape index: {}]   ;;  %s1212_s3 = inlined_call_operand.vmem [shape: f32[1,24], index: 3, kind: input, shape index: {}]   ;;  %s1213_s4 = inlined_call_operand.vmem [shape: f32[16,24], index: 4, kind: input, shape index: {}]   ;;  %s1214_s5 = inlined_call_operand.vmem [shape: f32[24,4], index: 5, kind: input, shape index: {}]   ;;  %s1215_s6 = inlined_call_operand.vmem [shape: f32[1,4], index: 6, kind: input, shape index: {}]   ;;  %s1216_s7 = inlined_call_operand.hbm [shape: f32[2,4], index: 7, kind: output, shape index: {}]  }
   0x1   :  { %v37_v0 = vld [vmem:[%s1209_s0] sm:$0xff]  ;;  %v678_v1 = vld [vmem:[%s1209_s0 + $0x10] sm:$0xff]  ;;  %888 = vset.pattern.permute.xlu0 %v927_v2  ;;  %889 = vset.pattern.permute.xlu1 %v927_v2  ;;  %v983_v3 = vld [vmem:[%s1210_s1 + $0x38] sm:$0xff] }
   0x2   :  { %40 = vperm.xlu0 %888, %v37_v0   ;;  %137 = vperm.xlu1 %889, %v678_v1   ;;  %v38_v4 = vld [vmem:[%s1209_s0 + $0x8] sm:$0xff]  ;;  %v679_v5 = vld [vmem:[%s1209_s0 + $0x18] sm:$0xff]  ;;  %v995_v6 = vld [vmem:[%s1210_s1 + $0x30] sm:$0xff] }
   0x3   :  { %761 = vmatprep.subr.mxu1 %v983_v3  ;;  %799 = vmatprep.subr.mxu0 %v983_v3  ;;  %v1004_v7 = vld [vmem:[%s1210_s1 + $0x28] sm:$0xff] }
   0x4   :  { %762 = vmatpush3.msra.mxu1 %v983_v3  ;;  %800 = vmatpush3.msra.mxu0 %v983_v3 }
   0x5   :  { %763 = vmatprep.subr.mxu1 %v995_v6  ;;  %801 = vmatprep.subr.mxu0 %v995_v6 }
   0x6   :  { %12 = vsyncpa [#allocation3], 0  ;;  %43 = vperm.xlu0 %888, %v38_v4   ;;  %140 = vperm.xlu1 %889, %v679_v5   ;;  %v684_v8 = vld [vmem:[%s1209_s0 + $0x20] sm:$0xff]  ;;  %v685_v9 = vld [vmem:[%s1209_s0 + $0x28] sm:$0xff]  ;;  %v35_v17 = vlaneseq  ;;  %vm51_vm0 = vcmask 523264   ;;  %v928_v21 = vmov 0.0  }
   0x7   :  { %764 = vmatpush3.msra.mxu1 %v995_v6  ;;  %802 = vmatpush3.msra.mxu0 %v995_v6  ;;  %v1019_v10 = vld [vmem:[%s1210_s1 + $0x20] sm:$0xff]  ;;  %v1027_v11 = vld [vmem:[%s1210_s1 + $0x18] sm:$0xff]  ;;  %v690_v12 = vld [vmem:[%s1209_s0 + $0x30] sm:$0xff]  ;;  %s929_s24 = smov 64   ;;  %s930_s12 = smov 32   ;;  %vm445_vm9 = vcmask 261120  }
   0x8   :  { %765 = vmatprep.subr.mxu1 %v1004_v7  ;;  %803 = vmatprep.subr.mxu0 %v1004_v7  ;;  %v691_v13 = vld [vmem:[%s1209_s0 + $0x38] sm:$0xff]  ;;  %v1043_v14 = vld [vmem:[%s1210_s1 + $0x10] sm:$0xff]  ;;  %v1050_v15 = vld [vmem:[%s1210_s1 + $0x8] sm:$0xff]  ;;  %v1071_v18 = vand.u32 127, %v35_v17  ;;  %s931_s17 = smov 96   ;;  %vm450_vm10 = vcmask 785408  }
   0x9   :  { %766 = vmatpush3.msra.mxu1 %v1004_v7  ;;  %804 = vmatpush3.msra.mxu0 %v1004_v7  ;;  %v1059_v16 = vld [vmem:[%s1210_s1] sm:$0xff]  ;;  %v468_v36 = vld [vmem:[%s1211_s2 + $0x78] sm:$0xff]  ;;  %v467_v37 = vld [vmem:[%s1211_s2 + $0x70] sm:$0xff]  ;;  %vm932_vm11 = vmmov 0   ;;  %vm557_vm12 = vcmask 195584   ;;  %vm584_vm13 = vcmask 1041409  }
   0xa   :  { %233 = vperm.xlu0 %888, %v684_v8   ;;  %236 = vperm.xlu1 %889, %v685_v9   ;;  %v466_v38 = vld [vmem:[%s1211_s2 + $0x68] sm:$0xff]  ;;  %v465_v39 = vld [vmem:[%s1211_s2 + $0x60] sm:$0xff]  ;;  %v464_v40 = vld [vmem:[%s1211_s2 + $0x58] sm:$0xff]  ;;  %s933_s28 = smov [#allocation2]   ;;  %vm658_vm14 = vcmask 25600  }
   0xb   :  { %767 = vmatprep.subr.mxu1 %v1019_v10  ;;  %805 = vmatprep.subr.mxu0 %v1019_v10  ;;  %v463_v41 = vld [vmem:[%s1211_s2 + $0x50] sm:$0xff]  ;;  %v462_v44 = vld [vmem:[%s1211_s2 + $0x48] sm:$0xff]  ;;  %v461_v46 = vld [vmem:[%s1211_s2 + $0x40] sm:$0xff]  ;;  %s666_s0 = sshll.u32 %s933_s28, 4  ;;  %s667_s0 = int_to_ptr.vmem [resolvable:$true] %s666_s0 }
   0xc   :  { %768 = vmatpush3.msra.mxu1 %v1019_v10  ;;  %806 = vmatpush3.msra.mxu0 %v1019_v10  ;;  %v460_v48 = vld [vmem:[%s1211_s2 + $0x38] sm:$0xff]  ;;  %v459_v49 = vld [vmem:[%s1211_s2 + $0x30] sm:$0xff]  ;;  %v458_v50 = vld [vmem:[%s1211_s2 + $0x28] sm:$0xff]  ;;  %s905_s29 = scalar_lea.vmem %s667_s0, 32  ;;  %p910_p1 = scmp.lt.s32.totalorder %s667_s0, %s667_s0 }
   0xd   :  { %769 = vmatprep.subr.mxu1 %v1027_v11  ;;  %807 = vmatprep.subr.mxu0 %v1027_v11  ;;  %v457_v52 = vld [vmem:[%s1211_s2 + $0x20] sm:$0xff]  ;;  %v456_v54 = vld [vmem:[%s1211_s2 + $0x18] sm:$0xff]  ;;  %v455_v57 = vld [vmem:[%s1211_s2 + $0x10] sm:$0xff]  ;;  %p906_p0 = scmp.ne.s32.totalorder %s667_s0, %s905_s29  ;;  %p911_p2 = scmp.lt.s32.totalorder %s905_s29, %s905_s29 }
   0xe   :  { %329 = vperm.xlu0 %888, %v690_v12   ;;  %332 = vperm.xlu1 %889, %v691_v13   ;;  %v454_v58 = vld [vmem:[%s1211_s2 + $0x8] sm:$0xff]  ;;  %v453_v59 = vld [vmem:[%s1211_s2] sm:$0xff] }
   0xf   :  { %770 = vmatpush3.msra.mxu1 %v1027_v11  ;;  %808 = vmatpush3.msra.mxu0 %v1027_v11  ;;  %v696_v17 = vld [vmem:[%s1212_s3] ss:$0 sm:$0xff]  ;;  %p912_p3 = por %p911_p2, %p910_p1 }
  0x10   :  { %771 = vmatprep.subr.mxu1 %v1043_v14  ;;  %809 = vmatprep.subr.mxu0 %v1043_v14 }
  0x11   :  { %772 = vmatpush3.msra.mxu1 %v1043_v14  ;;  %810 = vmatpush3.msra.mxu0 %v1043_v14  ;;  %p913_p4 = pnand %p912_p3, %p906_p0 }
  0x12   :  { %773 = vmatprep.subr.mxu1 %v1050_v15  ;;  %811 = vmatprep.subr.mxu0 %v1050_v15 }
  0x13   :  { %774 = vmatpush3.msra.mxu1 %v1050_v15  ;;  %812 = vmatpush3.msra.mxu0 %v1050_v15 }
  0x14   :  { %775 = vmatprep.subr.mxu1 %v1059_v16  ;;  %813 = vmatprep.subr.mxu0 %v1059_v16 }
  0x15   :  { %776 = vmatpush3.msra.mxu1 %v1059_v16  ;;  %814 = vmatpush3.msra.mxu0 %v1059_v16 }
  0x16   :  { %780 = vmatprep.subr.mxu1 %v983_v3  ;;  %837 = vmatprep.subr.mxu0 %v468_v36 }
  0x7d   :  { %v41_v19 = vpop.permute.xlu0 %40  ;;  %v138_v20 = vpop.permute.xlu1 %137 }
  0x7e   :  { %vm45_vm1 = vcmp.eq.s32.totalorder %v1071_v18, %v41_v19  ;;  %vm142_vm2 = vcmp.eq.s32.totalorder %v1071_v18, %v138_v20  ;;  %v554_v20 = vld [vmem:[%s1213_s4 + $0x8] sm:$0xff] }
  0x7f   :  { %v674_v22 = vsel %vm45_vm1, 1.0, %v928_v21  ;;  %v680_v25 = vsel %vm142_vm2, 1.0, %v928_v21 }
  0x80   :  { %777 = vmatprep.mubr.msk.f32.mxu1 %vm51_vm0, %v674_v22 }
  0x81   :  { %v44_v23 = vpop.permute.xlu0 %43  ;;  %v141_v24 = vpop.permute.xlu1 %140 }
  0x82   :  { %vm46_vm3 = vcmp.eq.s32.totalorder %v1071_v18, %v44_v23  ;;  %vm143_vm6 = vcmp.eq.s32.totalorder %v1071_v18, %v141_v24 }
  0x83   :  { %v675_v26 = vsel %vm46_vm3, 1.0, %v928_v21  ;;  %v681_v32 = vsel %vm143_vm6, 1.0, %v928_v21 }
  0x84   :  { %778 = vmatmul.mubr.msk.f32.vlgmr.msra.gmra.mxu1 %vm51_vm0, %v675_v26 }
  0x85   :  { %781 = vmatpush3.msra.mxu1 %v983_v3  ;;  %v234_v27 = vpop.permute.xlu0 %233  ;;  %v237_v28 = vpop.permute.xlu1 %236  ;;  %796 = vmatprep.mubr.msk.f32.mxu1 %vm51_vm0, %v680_v25  ;;  %v553_v25 = vld [vmem:[%s1213_s4] sm:$0xff] }
  0x86   :  { %vm238_vm4 = vcmp.eq.s32.totalorder %v1071_v18, %v234_v27  ;;  %782 = vmatprep.subr.mxu1 %v995_v6  ;;  %vm239_vm5 = vcmp.eq.s32.totalorder %v1071_v18, %v237_v28 }
  0x87   :  { %783 = vmatpush3.msra.mxu1 %v995_v6  ;;  %v686_v29 = vsel %vm238_vm4, 1.0, %v928_v21  ;;  %v687_v30 = vsel %vm239_vm5, 1.0, %v928_v21 }
  0x88   :  { %784 = vmatprep.subr.mxu1 %v1004_v7  ;;  %815 = vmatprep.mubr.msk.f32.mxu0 %vm51_vm0, %v686_v29 }
  0x89   :  { %785 = vmatpush3.msra.mxu1 %v1004_v7  ;;  %816 = vmatmul.mubr.msk.f32.vlgmr.msra.gmra.mxu0 %vm51_vm0, %v687_v30  ;;  %v330_v31 = vpop.permute.xlu0 %329  ;;  %v333_v34 = vpop.permute.xlu1 %332 }
  0x8a   :  { %786 = vmatprep.subr.mxu1 %v1019_v10  ;;  %vm334_vm7 = vcmp.eq.s32.totalorder %v1071_v18, %v330_v31  ;;  %vm335_vm8 = vcmp.eq.s32.totalorder %v1071_v18, %v333_v34  ;;  %838 = vmatpush3.msra.mxu0 %v468_v36 }
  0x8b   :  { %787 = vmatpush3.msra.mxu1 %v1019_v10  ;;  %v692_v33 = vsel %vm334_vm7, 1.0, %v928_v21  ;;  %v693_v35 = vsel %vm335_vm8, 1.0, %v928_v21  ;;  %839 = vmatprep.subr.mxu0 %v467_v37 }
  0x8c   :  { %788 = vmatprep.subr.mxu1 %v1027_v11  ;;  %840 = vmatpush3.msra.mxu0 %v467_v37 }
  0x8d   :  { %789 = vmatpush3.msra.mxu1 %v1027_v11  ;;  %841 = vmatprep.subr.mxu0 %v466_v38 }
  0x8e   :  { %790 = vmatprep.subr.mxu1 %v1043_v14  ;;  %842 = vmatpush3.msra.mxu0 %v466_v38 }
  0x8f   :  { %791 = vmatpush3.msra.mxu1 %v1043_v14  ;;  %843 = vmatprep.subr.mxu0 %v465_v39 }
  0x90   :  { %792 = vmatprep.subr.mxu1 %v1050_v15  ;;  %844 = vmatpush3.msra.mxu0 %v465_v39 }
  0x91   :  { %793 = vmatpush3.msra.mxu1 %v1050_v15  ;;  %845 = vmatprep.subr.mxu0 %v464_v40 }
  0x92   :  { %794 = vmatprep.subr.mxu1 %v1059_v16  ;;  %846 = vmatpush3.msra.mxu0 %v464_v40 }
  0x93   :  { %795 = vmatpush3.msra.mxu1 %v1059_v16  ;;  %847 = vmatprep.subr.mxu0 %v463_v41 }
  0x94   :  { %797 = vmatmul.mubr.msk.f32.vlgmr.msra.gmra.mxu1 %vm51_vm0, %v681_v32  ;;  %818 = vmatprep.subr.mxu1 %v983_v3 }
  0x95   :  { %819 = vmatpush3.msra.mxu1 %v983_v3  ;;  %834 = vmatprep.mubr.msk.f32.mxu1 %vm51_vm0, %v692_v33 }
  0x96   :  { %820 = vmatprep.subr.mxu1 %v995_v6  ;;  %848 = vmatpush3.msra.mxu0 %v463_v41 }
  0x97   :  { %821 = vmatpush3.msra.mxu1 %v995_v6  ;;  %849 = vmatprep.subr.mxu0 %v462_v44 }
  0x98   :  { %822 = vmatprep.subr.mxu1 %v1004_v7  ;;  %850 = vmatpush3.msra.mxu0 %v462_v44 }
  0x99   :  { %823 = vmatpush3.msra.mxu1 %v1004_v7  ;;  %851 = vmatprep.subr.mxu0 %v461_v46 }
  0x9a   :  { %824 = vmatprep.subr.mxu1 %v1019_v10  ;;  %852 = vmatpush3.msra.mxu0 %v461_v46 }
  0x9b   :  { %825 = vmatpush3.msra.mxu1 %v1019_v10  ;;  %853 = vmatprep.subr.mxu0 %v460_v48 }
  0x9c   :  { %826 = vmatprep.subr.mxu1 %v1027_v11  ;;  %854 = vmatpush3.msra.mxu0 %v460_v48 }
  0x9d   :  { %827 = vmatpush3.msra.mxu1 %v1027_v11  ;;  %855 = vmatprep.subr.mxu0 %v459_v49 }
  0x9e   :  { %828 = vmatprep.subr.mxu1 %v1043_v14  ;;  %856 = vmatpush3.msra.mxu0 %v459_v49 }
  0x9f   :  { %829 = vmatpush3.msra.mxu1 %v1043_v14  ;;  %857 = vmatprep.subr.mxu0 %v458_v50  ;;  %v574_v14 = vld [vmem:[%s1214_s5 + $0x10] sm:$0xff] }
  0xa0   :  { %830 = vmatprep.subr.mxu1 %v1050_v15  ;;  %858 = vmatpush3.msra.mxu0 %v458_v50 }
  0xa1   :  { %831 = vmatpush3.msra.mxu1 %v1050_v15  ;;  %859 = vmatprep.subr.mxu0 %v457_v52  ;;  %v573_v15 = vld [vmem:[%s1214_s5 + $0x8] sm:$0xff] }
  0xa2   :  { %832 = vmatprep.subr.mxu1 %v1059_v16  ;;  %860 = vmatpush3.msra.mxu0 %v457_v52 }
  0xa3   :  { %833 = vmatpush3.msra.mxu1 %v1059_v16  ;;  %861 = vmatprep.subr.mxu0 %v456_v54  ;;  %v572_v16 = vld [vmem:[%s1214_s5] sm:$0xff] }
  0xa4   :  { %835 = vmatmul.mubr.msk.f32.vlgmr.msra.gmra.mxu1 %vm51_vm0, %v693_v35  ;;  %872 = vmatprep.subr.mxu1 %v928_v21 }
  0xa5   :  { %862 = vmatpush3.msra.mxu0 %v456_v54  ;;  %873 = vmatpush3.msra.mxu1 %v574_v14 }
  0xa6   :  { %863 = vmatprep.subr.mxu0 %v455_v57  ;;  %874 = vmatprep.subr.mxu1 %v928_v21 }
  0xa7   :  { %864 = vmatpush3.msra.mxu0 %v455_v57  ;;  %875 = vmatpush3.msra.mxu1 %v573_v15 }
  0xa8   :  { %865 = vmatprep.subr.mxu0 %v454_v58  ;;  %876 = vmatprep.subr.mxu1 %v928_v21 }
  0xa9   :  { %866 = vmatpush3.msra.mxu0 %v454_v58  ;;  %878 = vmatprep.mubr.msk.f32.mxu1 %vm932_vm11, %v928_v21 }
  0xaa   :  { %867 = vmatprep.subr.mxu0 %v453_v59  ;;  %877 = vmatpush3.msra.mxu1 %v572_v16 }
  0xab   :  { %868 = vmatpush3.msra.mxu0 %v453_v59 }
 0x144   :  { %v779_v47 = vpop.f32.mrf.mxu1 }
 0x146   :  { %v124_v51 = vpop.f32.mrf.mxu1 }
 0x149   :  { %v817_v42 = vpop.f32.mrf.mxu0 }
 0x14b   :  { %v316_v43 = vpop.f32.mrf.mxu0 }
 0x14c   :  { %v895_v45 = vpack.i.bf16 %v817_v42, %v316_v43  ;;  %v697_v43 = vld [vmem:[%s1215_s6] ss:$0 sm:$0xff] }
 0x14e   :  { %896 = vrot.lane.b32.xlu1 %v895_v45, %s929_s24 }
 0x154   :  { %v798_v53 = vpop.f32.mrf.mxu1 }
 0x156   :  { %v220_v55 = vpop.f32.mrf.mxu1 }
 0x157   :  { %v890_v56 = vpack.i.bf16 %v798_v53, %v220_v55 }
 0x159   :  { %891 = vrot.lane.b32.xlu0 %v890_v56, %s930_s12 }
 0x164   :  { %v836_v60 = vpop.f32.mrf.mxu1 }
 0x166   :  { %v412_v61 = vpop.f32.mrf.mxu1 }
 0x167   :  { %v900_v62 = vpack.i.bf16 %v836_v60, %v412_v61 }
 0x169   :  { %901 = vrot.lane.b32.xlu0 %v900_v62, %s931_s17 }
 0x1c0   :  { %v897_v2 = vpop.permute.xlu1 %896 }
 0x1c1   :  { %v899_v5 = vunpack.i.h.bf16 %v897_v2  ;;  %v898_v6 = vunpack.i.l.bf16 %v897_v2 }
 0x1cb   :  { %v892_v63 = vpop.permute.xlu0 %891 }
 0x1cc   :  { %v894_v0 = vunpack.i.h.bf16 %v892_v63  ;;  %v893_v1 = vunpack.i.l.bf16 %v892_v63 }
 0x1ce   :  { %v447_v3 = vsel %vm445_vm9, %v779_v47, %v894_v0  ;;  %v446_v4 = vsel %vm445_vm9, %v124_v51, %v893_v1 }
 0x1cf   :  { %v448_v10 = vsel %vm51_vm0, %v446_v4, %v898_v6  ;;  %v449_v11 = vsel %vm51_vm0, %v447_v3, %v899_v5 }
 0x1db   :  { %v902_v7 = vpop.permute.xlu0 %901 }
 0x1dc   :  { %v904_v8 = vunpack.i.h.bf16 %v902_v7  ;;  %v903_v9 = vunpack.i.l.bf16 %v902_v7 }
 0x1de   :  { %v451_v12 = vsel %vm450_vm10, %v448_v10, %v903_v9  ;;  %v452_v13 = vsel %vm450_vm10, %v449_v11, %v904_v8 }
 0x1df   :  { %869 = vmatprep.mubr.f32.mxu0 %v451_v12 }
 0x1e0   :  { %870 = vmatmul.mubr.f32.vlgmr.msra.gmra.mxu0 %v452_v13 }
 0x2a0   :  { %v871_v18 = vpop.f32.mrf.mxu0 }
 0x2a1   :  { %v548_v19 = vadd.f32 %v871_v18, %v696_v17 }
 0x2a2   :  { %v542_v22 = vpop.f32.mrf.mxu0 }
 0x2a3   :  { %v552_v23 = vmax.f32 %v548_v19, 0.0  ;;  %v543_v24 = vadd.f32 %v696_v17, %v542_v22 }
 0x2a5   :  { %v556_v21 = vmul.f32 %v554_v20, %v552_v23  ;;  %v551_v26 = vmax.f32 %v543_v24, 0.0 }
 0x2a7   :  { %v565_v27 = vsel %vm557_vm12, %v556_v21, -inf  ;;  %v555_v28 = vmul.f32 %v553_v25, %v551_v26 }
 0x2a8   :  { %v566_v29 = vrot.slane %v565_v27, 4 }
 0x2a9   :  { %v558_v30 = vsel %vm557_vm12, %v555_v28, -inf }
 0x2aa   :  { %v567_v31 = vmax.f32 %v565_v27, %v566_v29  ;;  %v559_v32 = vrot.slane %v558_v30, 4 }
 0x2ac   :  { %v568_v33 = vrot.slane %v567_v31, 2  ;;  %v560_v34 = vmax.f32 %v558_v30, %v559_v32 }
 0x2ae   :  { %v569_v35 = vmax.f32 %v567_v31, %v568_v33  ;;  %v561_v36 = vrot.slane %v560_v34, 2 }
 0x2b0   :  { %v570_v37 = vrot.slane %v569_v35, 1  ;;  %v562_v38 = vmax.f32 %v560_v34, %v561_v36 }
 0x2b2   :  { %v563_v39 = vrot.slane %v562_v38, 1  ;;  %v571_v40 = vmax.f32 %v569_v35, %v570_v37 }
 0x2b4   :  { %v564_v41 = vmax.f32 %v562_v38, %v563_v39 }
 0x2b6   :  { %v585_v42 = vsel %vm584_vm13, %v571_v40, %v564_v41 }
 0x2b7   :  { %879 = vmatmul.mubr.msk.f32.vlgmr.msra.gmra.mxu1 %vm557_vm12, %v585_v42 }
 0x377   :  { %v654_v44 = vpop.f32.mrf.mxu1 }
 0x378   :  { %v655_v45 = vadd.f32 %v697_v43, %v654_v44 }
 0x379   :  { %v880_v46 = vpop.f32.mrf.mxu1 }
 0x37a   :  { %659 = vst.msk [vmem:[#allocation2] sm:$0x3] %vm658_vm14, %v655_v45 }
 0x37b   :  { %916 = shalt.err (!%p913_p4)
}
 0x37c   :  { %669 = dma.vmem_to_hbm [thread:$0]  %s667_s0, 32, %s1216_s7, [#allocation3]  }
 0x37d   :  { %925 = dma.done.wait [#allocation3], 32  }
 0x37e   :  { %926 = vsyncadd [#allocation3], 4294967264 }
 0x37f   :  { %673 = vsyncpa [#allocation3], 1 }

</bundles_post_ra>
